<compile_context>
chip_gen: v7x
topology: tpu7x:2x2x1
jax: 0.10.0
libtpu: 0.0.40
codegen_flags: <defaults>
</compile_context>

<pallas_src>
import jax
import jax.numpy as jnp
from jax.experimental import pallas as pl
from jax.experimental.pallas import tpu as pltpu

EPS = 1e-5                      # PyTorch GroupNorm default
_VMEM_LIMIT = 32 * 1024 * 1024  # explicit scoped-VMEM budget (safe on v5e/v6e/v7x)
_MAX_S_TILE = 4096              # lane-dense spatial tile upper bound


# ----------------------------- Pallas kernels ------------------------------ #

def _pool_sum_kernel(x_ref, sum_ref):
    """Accumulating global spatial sum.  x_ref: (1, C, TS), sum_ref: (1, C, 1)."""
    @pl.when(pl.program_id(1) == 0)
    def _():
        sum_ref[...] = jnp.zeros_like(sum_ref)
    sum_ref[...] += jnp.sum(x_ref[...], axis=-1, keepdims=True)


def _broadcast_add_kernel(x_ref, add_ref, o_ref):
    """Residual broadcast add.  x_ref/o_ref: (1, C, TS), add_ref: (1, C, 1)."""
    o_ref[...] = x_ref[...] + add_ref[...]


# ------------------------------ host wrappers ------------------------------ #

def _pick_spatial_tile(S, max_tile=_MAX_S_TILE):
    """Largest multiple-of-128 divisor of S that is <= max_tile (or S itself)."""
    if S <= max_tile or S % 128 != 0:
        return S
    for ts in range(max_tile - max_tile % 128, 0, -128):
        if S % ts == 0:
            return ts
    return S


def _context_mlp(ctx, w1, b1, gamma, beta, w2, b2, G):
    """conv1x1 -> GroupNorm(G) -> ReLU -> conv1x1 on the pooled (N, C) context.

    Tiny (O(N*C*Cr) flops) -> plain JAX / VPU, deliberately kept off the MXU and
    outside the memory-bound Pallas passes.
    """
    y = ctx @ w1.T + b1                                       # (N, Cr)
    N, Cr = y.shape
    yg = y.reshape(N, G, Cr // G)
    mu = yg.mean(-1, keepdims=True)
    var = ((yg - mu) ** 2).mean(-1, keepdims=True)            # biased, as in GroupNorm
    yn = ((yg - mu) * jax.lax.rsqrt(var + EPS)).reshape(N, Cr) * gamma + beta
    yr = jnp.maximum(yn, 0.0)
    return yr @ w2.T + b2                                     # (N, C)


def gc_block(x, w1, b1, gamma, beta, w2, b2, num_reduced_groups):
    """x: (N, C, D, H, W) float32.  Returns the same shape (GCBlock forward)."""
    N, C, D, H, W = x.shape
    S = D * H * W
    x3 = x.reshape(N, C, S)           # free view of contiguous NCDHW -- no HBM transpose
    TS = _pick_spatial_tile(S)
    n_s = S // TS

    # ---- pass 1: tiled global-sum pool (accumulator over the S grid axis) ----
    sums = pl.pallas_call(
        _pool_sum_kernel,
        out_shape=jax.ShapeDtypeStruct((N, C, 1), jnp.float32),
        grid=(N, n_s),
        in_specs=[pl.BlockSpec((1, C, TS), lambda n, s: (n, 0, s))],
        out_specs=pl.BlockSpec((1, C, 1), lambda n, s: (n, 0, 0)),
        compiler_params=pltpu.CompilerParams(
            dimension_semantics=("parallel", "arbitrary"),
            vmem_limit_bytes=_VMEM_LIMIT),
    )(x3)
    ctx = sums[:, :, 0] * (1.0 / S)                           # (N, C) global average pool

    # ---- tiny bottleneck MLP on the pooled context (plain JAX) ----
    add = _context_mlp(ctx, w1, b1, gamma, beta, w2, b2, num_reduced_groups)
    add3 = add.reshape(N, C, 1).astype(x.dtype)               # broadcast source

    # ---- pass 2: lane-dense tiled broadcast residual add ----
    # TODO(synk): could add input_output_aliases={0: 0} to write the residual in
    # place once the surrounding graph guarantees x3 is dead after pass 1.
    out3 = pl.pallas_call(
        _broadcast_add_kernel,
        out_shape=jax.ShapeDtypeStruct((N, C, S), x.dtype),
        grid=(N, n_s),
        in_specs=[pl.BlockSpec((1, C, TS), lambda n, s: (n, 0, s)),
                  pl.BlockSpec((1, C, 1), lambda n, s: (n, 0, 0))],
        out_specs=pl.BlockSpec((1, C, TS), lambda n, s: (n, 0, s)),
        compiler_params=pltpu.CompilerParams(
            dimension_semantics=("parallel", "parallel"),
            vmem_limit_bytes=_VMEM_LIMIT),
    )(x3, add3)

    return out3.reshape(N, C, D, H, W)


def gc_block_reference(x, w1, b1, gamma, beta, w2, b2, G):
    """Pure-JAX reference matching the PyTorch forward."""
    ctx = jnp.mean(x, axis=(2, 3, 4))                         # (N, C)
    add = _context_mlp(ctx, w1, b1, gamma, beta, w2, b2, G)   # (N, C)
    return x + add[:, :, None, None, None]


# ---------------------------------- demo ----------------------------------- #

if __name__ == "__main__":
    # Small shapes consistent with the module: Conv3d -> 5-D NCDHW input.
    N, C, D, H, W = 2, 16, 8, 8, 8
    num_groups, ratio = 8, 8
    Cr = C // ratio                        # 2
    G = num_groups // ratio                # 1

    key = jax.random.PRNGKey(0)
    ks = jax.random.split(key, 7)
    x = jax.random.normal(ks[0], (N, C, D, H, W), jnp.float32)
    w1 = 0.1 * jax.random.normal(ks[1], (Cr, C), jnp.float32)   # Conv3d weight (Cr,C,1,1,1)
    b1 = 0.1 * jax.random.normal(ks[2], (Cr,), jnp.float32)
    gamma = 1.0 + 0.1 * jax.random.normal(ks[3], (Cr,), jnp.float32)
    beta = 0.1 * jax.random.normal(ks[4], (Cr,), jnp.float32)
    w2 = 0.1 * jax.random.normal(ks[5], (C, Cr), jnp.float32)   # Conv3d weight (C,Cr,1,1,1)
    b2 = 0.1 * jax.random.normal(ks[6], (C,), jnp.float32)

    gc_fn = jax.jit(gc_block, static_argnums=(7,))
    out = jax.block_until_ready(gc_fn(x, w1, b1, gamma, beta, w2, b2, G))

    ref = gc_block_reference(x, w1, b1, gamma, beta, w2, b2, G)
    assert out.shape == x.shape and out.dtype == jnp.float32
    assert jnp.allclose(out, ref, atol=1e-4, rtol=1e-4), "kernel mismatch vs reference"
    print("KERNEL_OK")
</pallas_src>

<mosaic_0001>
module attributes {stable_mosaic.version = 11 : i64} {
  func.func @_pool_sum_kernel(%arg0: i32, %arg1: i32, %arg2: memref<1x16x512xf32, #tpu.memory_space<vmem>>, %arg3: memref<1x16x1xf32, #tpu.memory_space<vmem>>) attributes {dimension_semantics = [#tpu.dimension_semantics<parallel>, #tpu.dimension_semantics<arbitrary>], iteration_bounds = array<i64: 2, 1>, scalar_prefetch = 0 : i64, scratch_operands = 0 : i64, tpu.core_type = #tpu.core_type<tc>, window_params = [{transform_indices = @transform_0, window_bounds = array<i64: 1, 16, 512>}, {transform_indices = @transform_1, window_bounds = array<i64: 1, 16, 1>}]} {
    %c0_i32 = arith.constant 0 : i32
    %0 = arith.cmpi eq, %arg1, %c0_i32 : i32
    %1 = arith.extui %0 : i1 to i32
    %c0_i32_0 = arith.constant 0 : i32
    %2 = arith.cmpi ne, %1, %c0_i32_0 : i32
    scf.if %2 {
      %cst_9 = arith.constant 0.000000e+00 : f32
      %9 = vector.broadcast %cst_9 : f32 to vector<1x16x1xf32>
      %c0_10 = arith.constant 0 : index
      %c0_11 = arith.constant 0 : index
      %c0_12 = arith.constant 0 : index
      %10 = vector.load %arg3[%c0_10, %c0_11, %c0_12] : memref<1x16x1xf32, #tpu.memory_space<vmem>>, vector<1x16x1xf32>
      tpu.vector_store %arg3[%c0_10, %c0_11, %c0_12], %9 {strides = array<i32>} : memref<1x16x1xf32, #tpu.memory_space<vmem>>, vector<1x16x1xf32>,
    } else {
    }
    %c0 = arith.constant 0 : index
    %c0_1 = arith.constant 0 : index
    %c0_2 = arith.constant 0 : index
    %3 = vector.load %arg3[%c0, %c0_1, %c0_2] : memref<1x16x1xf32, #tpu.memory_space<vmem>>, vector<1x16x1xf32>
    %c0_3 = arith.constant 0 : index
    %c0_4 = arith.constant 0 : index
    %c0_5 = arith.constant 0 : index
    %4 = vector.load %arg2[%c0_3, %c0_4, %c0_5] : memref<1x16x512xf32, #tpu.memory_space<vmem>>, vector<1x16x512xf32>
    %cst = arith.constant dense<0.000000e+00> : vector<1x16xf32>
    %5 = vector.multi_reduction <add>, %4, %cst [2] : vector<1x16x512xf32> to vector<1x16xf32>
    %6 = vector.shape_cast %5 : vector<1x16xf32> to vector<1x16x1xf32>
    %7 = arith.addf %3, %6 : vector<1x16x1xf32>
    %c0_6 = arith.constant 0 : index
    %c0_7 = arith.constant 0 : index
    %c0_8 = arith.constant 0 : index
    %8 = vector.load %arg3[%c0_6, %c0_7, %c0_8] : memref<1x16x1xf32, #tpu.memory_space<vmem>>, vector<1x16x1xf32>
    tpu.vector_store %arg3[%c0_6, %c0_7, %c0_8], %7 {strides = array<i32>} : memref<1x16x1xf32, #tpu.memory_space<vmem>>, vector<1x16x1xf32>,
    return
  }
  func.func @transform_0(%arg0: i32, %arg1: i32) -> (i32, i32, i32) {
    %c0_i32 = arith.constant 0 : i32
    %c0_i32_0 = arith.constant 0 : i32
    return %arg0, %c0_i32, %arg1 : i32, i32, i32
  }
  func.func @transform_1(%arg0: i32, %arg1: i32) -> (i32, i32, i32) {
    %c0_i32 = arith.constant 0 : i32
    %c0_i32_0 = arith.constant 0 : i32
    %c0_i32_1 = arith.constant 0 : i32
    return %arg0, %c0_i32, %c0_i32_0 : i32, i32, i32
  }
}

module attributes {stable_mosaic.version = 11 : i64} {
  func.func @_broadcast_add_kernel(%arg0: i32, %arg1: i32, %arg2: memref<1x16x512xf32, #tpu.memory_space<vmem>>, %arg3: memref<1x16x1xf32, #tpu.memory_space<vmem>>, %arg4: memref<1x16x512xf32, #tpu.memory_space<vmem>>) attributes {dimension_semantics = [#tpu.dimension_semantics<parallel>, #tpu.dimension_semantics<parallel>], iteration_bounds = array<i64: 2, 1>, scalar_prefetch = 0 : i64, scratch_operands = 0 : i64, tpu.core_type = #tpu.core_type<tc>, window_params = [{transform_indices = @transform_0, window_bounds = array<i64: 1, 16, 512>}, {transform_indices = @transform_1, window_bounds = array<i64: 1, 16, 1>}, {transform_indices = @transform_2, window_bounds = array<i64: 1, 16, 512>}]} {
    %c0 = arith.constant 0 : index
    %c0_0 = arith.constant 0 : index
    %c0_1 = arith.constant 0 : index
    %0 = vector.load %arg2[%c0, %c0_0, %c0_1] : memref<1x16x512xf32, #tpu.memory_space<vmem>>, vector<1x16x512xf32>
    %c0_2 = arith.constant 0 : index
    %c0_3 = arith.constant 0 : index
    %c0_4 = arith.constant 0 : index
    %1 = vector.load %arg3[%c0_2, %c0_3, %c0_4] : memref<1x16x1xf32, #tpu.memory_space<vmem>>, vector<1x16x1xf32>
    %2 = vector.broadcast %1 : vector<1x16x1xf32> to vector<1x16x512xf32>
    %3 = arith.addf %0, %2 : vector<1x16x512xf32>
    %c0_5 = arith.constant 0 : index
    %c0_6 = arith.constant 0 : index
    %c0_7 = arith.constant 0 : index
    %4 = vector.load %arg4[%c0_5, %c0_6, %c0_7] : memref<1x16x512xf32, #tpu.memory_space<vmem>>, vector<1x16x512xf32>
    tpu.vector_store %arg4[%c0_5, %c0_6, %c0_7], %3 {strides = array<i32>} : memref<1x16x512xf32, #tpu.memory_space<vmem>>, vector<1x16x512xf32>,
    return
  }
  func.func @transform_0(%arg0: i32, %arg1: i32) -> (i32, i32, i32) {
    %c0_i32 = arith.constant 0 : i32
    %c0_i32_0 = arith.constant 0 : i32
    return %arg0, %c0_i32, %arg1 : i32, i32, i32
  }
  func.func @transform_1(%arg0: i32, %arg1: i32) -> (i32, i32, i32) {
    %c0_i32 = arith.constant 0 : i32
    %c0_i32_0 = arith.constant 0 : i32
    %c0_i32_1 = arith.constant 0 : i32
    return %arg0, %c0_i32, %c0_i32_0 : i32, i32, i32
  }
  func.func @transform_2(%arg0: i32, %arg1: i32) -> (i32, i32, i32) {
    %c0_i32 = arith.constant 0 : i32
    %c0_i32_0 = arith.constant 0 : i32
    return %arg0, %c0_i32, %arg1 : i32, i32, i32
  }
}

</mosaic_0001>

<bundles_post_ra>
// kernel: gc_block.2
= control target key start
LH: loop header
LB: loop body
LE: loop exit
PB: predicated region body
PF: predicated region fallthrough
CT: control target
= control target key end

     0   :  { %s319_s6 = smov 0   ;;  %s321_s7 = smov 0   ;;  %s356_s0 = inlined_call_operand.vmem [shape: f32[2,16,512], index: 0, kind: input, shape index: {}]   ;;  %s357_s1 = inlined_call_operand.vmem [shape: f32[2,16,1], index: 1, kind: output, shape index: {}]  }
   0x1   :  { %s323_s8 = smov 0  }
   0x2 LB: > { %s23_s9 = sadd.s32 1, %s302_s7  ;;  %p250_p0 = scmp.ge.s32.totalorder %s306_s8, 1  ;;  %s306_s8 = sphi %s323_s8, %s11_s8   ;;  %s302_s7 = sphi %s321_s7, %s359_s7   ;;  %s298_s6 = sphi %s319_s6, %s358_s6  }
   0x3   : > { %p25_p1 = scmp.ge.s32.totalorder %s23_s9, 2  ;;  %p106_p2 = scmp.lt.s32.totalorder %s306_s8, 3 }
   0x5   : > { %s361_s9 = smov (%p25_p1, %s23_s9), 0  ;;  %p107_p3 = pnand %p250_p0, %p106_p2 }
   0x6   : > { %p131_p4 = scmp.lt.s32.totalorder (!%p107_p3), %s298_s6, 1  ;;  %vm149_vm0 = vcmask (!%p107_p3), 7168   ;;  %v308_v3 = vmov (!%p107_p3), 0.0  }
   0x7   : > { %110 = sbr.rel (%p107_p3) target bundleno = 173 (0xad), region = 24 }
   0xe   : > { %s363_s6 = smov (!%p131_p4, %s298_s6), 1 }
   0xf   : > { %s257_s10 = sshll.u32 %s363_s6, 6  ;;  %s258_s11 = sshll.u32 %s363_s6, 4 }
  0x10   : > { %s138_s14 = scalar_lea.vmem %s356_s0, %s257_s10  ;;  %s144_s17 = scalar_lea.vmem %s357_s1, %s258_s11 }
  0x11   : > { %v154_v0 = vld [vmem:[%s138_s14] sm:$0xff]  ;;  %v155_v1 = vld [vmem:[%s138_s14 + $0x8] sm:$0xff]  ;;  %v156_v2 = vld [vmem:[%s138_s14 + $0x10] sm:$0xff]  ;;  %150 = vst.msk [vmem:[%s144_s17] sm:$0xff] %vm149_vm0, %v308_v3 }
  0x12   : > { %151 = vst.msk [vmem:[%s144_s17 + $0x8] sm:$0xff] %vm149_vm0, %v308_v3  ;;  %v162_v4 = vadd.f32 %v155_v1, %v154_v0  ;;  %v158_v5 = vld [vmem:[%s138_s14 + $0x20] sm:$0xff]  ;;  %v159_v6 = vld [vmem:[%s138_s14 + $0x28] sm:$0xff]  ;;  %v157_v7 = vld [vmem:[%s138_s14 + $0x18] sm:$0xff] }
  0x13   : > { %v160_v8 = vld [vmem:[%s138_s14 + $0x30] sm:$0xff]  ;;  %v167_v9 = vadd.f32 %v159_v6, %v158_v5  ;;  %v161_v11 = vld [vmem:[%s138_s14 + $0x38] sm:$0xff] }
  0x14   : > { %v163_v10 = vadd.f32 %v162_v4, %v156_v2 }
  0x15   : > { %v168_v12 = vadd.f32 %v167_v9, %v160_v8 }
  0x16   : > { %v164_v13 = vadd.f32 %v163_v10, %v157_v7 }
  0x17   : > { %v169_v14 = vadd.f32 %v168_v12, %v161_v11 }
  0x18   : > { %165 = vadd.xlane.f32.xlu0 %v164_v13  ;;  %v152_v15 = vld [vmem:[%s144_s17] sm:$0xff] }
  0x19   : > { %v153_v18 = vld [vmem:[%s144_s17 + $0x8] sm:$0xff] }
  0x1c   : > { %170 = vadd.xlane.f32.xlu0 %v169_v14 }
  0xa5   : > { %v166_v16 = vpop.xlane.xlu0 %165 }
  0xa6   : > { %v172_v17 = vadd.f32 %v166_v16, %v152_v15 }
  0xa8   : > { %175 = vst.msk [vmem:[%s144_s17] sm:$0xff] %vm149_vm0, %v172_v17 }
  0xa9   : > { %v171_v19 = vpop.xlane.xlu0 %170 }
  0xaa   : > { %v173_v20 = vadd.f32 %v171_v19, %v153_v18 }
  0xac   : > { %176 = vst.msk [vmem:[%s144_s17 + $0x8] sm:$0xff] %vm149_vm0, %v173_v20 }
  0xad PF: > { %s11_s8 = sadd.s32 1, %s306_s8   ;;  %s358_s6 = smov %s302_s7 }
  0xae   : > { %p8_p5 = scmp.ge.s32.totalorder %s11_s8, 4   ;;  %s359_s7 = smov %s361_s9 }
  0xb0   :  { %10 = sbr.rel (!%p8_p5) target bundleno = 2 (0x2), region = 58 }

// kernel: gc_block.3
= control target key start
LH: loop header
LB: loop body
LE: loop exit
PB: predicated region body
PF: predicated region fallthrough
CT: control target
= control target key end

     0   :  { %s420_s9 = smov 0   ;;  %s422_s10 = smov 0   ;;  %s456_s0 = inlined_call_operand.vmem [shape: f32[2,16,512], index: 0, kind: input, shape index: {}]   ;;  %s457_s1 = inlined_call_operand.vmem [shape: f32[2,16,1], index: 1, kind: input, shape index: {}]   ;;  %s458_s2 = inlined_call_operand.vmem [shape: f32[2,16,512], index: 2, kind: output, shape index: {}]  }
   0x1   :  { %s424_s11 = smov 0  }
   0x2 LB: > { %s24_s12 = sadd.s32 1, %s398_s10  ;;  %p342_p0 = scmp.ge.s32.totalorder %s402_s11, 1  ;;  %s402_s11 = sphi %s424_s11, %s12_s11   ;;  %s398_s10 = sphi %s422_s10, %s460_s10   ;;  %s394_s9 = sphi %s420_s9, %s459_s9  }
   0x3   : > { %p26_p1 = scmp.ge.s32.totalorder %s24_s12, 2  ;;  %p143_p2 = scmp.lt.s32.totalorder %s402_s11, 3 }
   0x5   : > { %s462_s12 = smov (%p26_p1, %s24_s12), 0  ;;  %p144_p3 = pnand %p342_p0, %p143_p2 }
   0x6   : > { %p179_p4 = scmp.lt.s32.totalorder (!%p144_p3), %s394_s9, 1  ;;  %v404_v0 = vmov (!%p144_p3), 0  }
   0x7   : > { %147 = sbr.rel (%p144_p3) target bundleno = 154 (0x9a), region = 28  ;;  %379 = vset.pattern.permute.xlu0 (!%p144_p3), %v404_v0 }
   0xe   : > { %s464_s9 = smov (!%p179_p4, %s394_s9), 1 }
   0xf   : > { %s352_s13 = sshll.u32 %s464_s9, 4  ;;  %s351_s17 = sshll.u32 %s464_s9, 6 }
  0x10   : > { %s192_s16 = scalar_lea.vmem %s457_s1, %s352_s13  ;;  %s186_s20 = scalar_lea.vmem %s456_s0, %s351_s17 }
  0x11   : > { %v211_v1 = vld [vmem:[%s192_s16] sm:$0xff]  ;;  %v212_v2 = vld [vmem:[%s192_s16 + $0x8] sm:$0xff]  ;;  %v205_v5 = vld [vmem:[%s186_s20 + $0x10] sm:$0xff]  ;;  %s201_s23 = scalar_lea.vmem %s458_s2, %s351_s17 }
  0x12   : > { %215 = vperm.xlu0 %379, %v211_v1   ;;  %v203_v3 = vld [vmem:[%s186_s20] sm:$0xff]  ;;  %v204_v4 = vld [vmem:[%s186_s20 + $0x8] sm:$0xff]  ;;  %v206_v6 = vld [vmem:[%s186_s20 + $0x18] sm:$0xff] }
  0x13   : > { %v207_v12 = vld [vmem:[%s186_s20 + $0x20] sm:$0xff]  ;;  %v208_v13 = vld [vmem:[%s186_s20 + $0x28] sm:$0xff]  ;;  %v209_v14 = vld [vmem:[%s186_s20 + $0x30] sm:$0xff] }
  0x14   : > { %v210_v15 = vld [vmem:[%s186_s20 + $0x38] sm:$0xff] }
  0x16   : > { %220 = vperm.xlu0 %379, %v212_v2  }
  0x91   : > { %v216_v7 = vpop.permute.xlu0 %215 }
  0x92   : > { %v223_v8 = vadd.f32 %v216_v7, %v203_v3  ;;  %v224_v9 = vadd.f32 %v216_v7, %v204_v4  ;;  %v225_v10 = vadd.f32 %v216_v7, %v205_v5  ;;  %v226_v11 = vadd.f32 %v216_v7, %v206_v6 }
  0x94   : > { %231 = vst [vmem:[%s201_s23] sm:$0xff] %v223_v8  ;;  %232 = vst [vmem:[%s201_s23 + $0x8] sm:$0xff] %v224_v9 }
  0x95   : > { %233 = vst [vmem:[%s201_s23 + $0x10] sm:$0xff] %v225_v10  ;;  %234 = vst [vmem:[%s201_s23 + $0x18] sm:$0xff] %v226_v11  ;;  %v221_v16 = vpop.permute.xlu0 %220 }
  0x96   : > { %v227_v17 = vadd.f32 %v221_v16, %v207_v12  ;;  %v228_v18 = vadd.f32 %v221_v16, %v208_v13  ;;  %v229_v19 = vadd.f32 %v221_v16, %v209_v14  ;;  %v230_v20 = vadd.f32 %v221_v16, %v210_v15 }
  0x98   : > { %235 = vst [vmem:[%s201_s23 + $0x20] sm:$0xff] %v227_v17  ;;  %236 = vst [vmem:[%s201_s23 + $0x28] sm:$0xff] %v228_v18 }
  0x99   : > { %237 = vst [vmem:[%s201_s23 + $0x30] sm:$0xff] %v229_v19  ;;  %238 = vst [vmem:[%s201_s23 + $0x38] sm:$0xff] %v230_v20 }
  0x9a PF: > { %s12_s11 = sadd.s32 1, %s402_s11   ;;  %s459_s9 = smov %s398_s10 }
  0x9b   : > { %p9_p5 = scmp.ge.s32.totalorder %s12_s11, 4   ;;  %s460_s10 = smov %s462_s12 }
  0x9d   :  { %11 = sbr.rel (!%p9_p5) target bundleno = 2 (0x2), region = 61 }

</bundles_post_ra>
